<compile_context>
chip_gen: v7x
topology: tpu7x:2x2x1
jax: 0.10.0
libtpu: 0.0.40
codegen_flags: <defaults>
</compile_context>

<pallas_src>
import jax
import jax.numpy as jnp
from jax.experimental import pallas as pl
from jax.experimental.pallas import tpu as pltpu

MAX_TILE_N = 2048   # batch rows per grid step (f32 x-tile @ in=32 is ~256 KiB)
SUBLANE = 8         # f32 sublane packing


def _round_up(a: int, b: int) -> int:
    return ((a + b - 1) // b) * b


def mlp_kernel(x_ref, w1_ref, b1_ref, w2_ref, b2_ref, o_ref):
    # hidden = relu(x @ W1 + b1); out = hidden @ W2 + b2   (all f32, f32 acc)
    h = jnp.dot(x_ref[...], w1_ref[...], preferred_element_type=jnp.float32)
    h = jnp.maximum(h + b1_ref[...], 0.0)
    o = jnp.dot(h, w2_ref[...], preferred_element_type=jnp.float32)
    o_ref[...] = (o + b2_ref[...]).astype(o_ref.dtype)


def neuralnet_forward(x, w1_t, b1, w2_t, b2):
    """x: (N, in_size); w1_t: (in_size, h); b1: (1, h); w2_t: (h, out); b2: (1, out).

    Weights are the PyTorch nn.Linear weights pre-transposed to (in, out).
    Returns (N, out_size) float32.
    """
    N, in_size = x.shape
    hdim = w1_t.shape[1]
    out_size = w2_t.shape[1]

    # Batch tiling only; feature dims stay at their real (unpadded) sizes.
    if N <= MAX_TILE_N:
        tile_n = N              # single tile: block dim == full array dim
        n_pad = N
    else:
        tile_n = MAX_TILE_N     # multiple of 8 (f32 sublane) by construction
        n_pad = _round_up(N, tile_n)
    grid = (n_pad // tile_n,)

    x_p = x if n_pad == N else jnp.pad(x, ((0, n_pad - N), (0, 0)))

    x_p = x_p.astype(jnp.float32)
    w1_p = w1_t.astype(jnp.float32)
    b1_p = b1.astype(jnp.float32)
    w2_p = w2_t.astype(jnp.float32)
    b2_p = b2.astype(jnp.float32)

    # Advisory cost estimate on real (unpadded) shapes.
    flops = 2 * N * (in_size * hdim + hdim * out_size)
    bytes_accessed = 4 * (x_p.size + w1_p.size + b1_p.size + w2_p.size
                          + b2_p.size + n_pad * out_size)

    out_padded = pl.pallas_call(
        mlp_kernel,
        out_shape=jax.ShapeDtypeStruct((n_pad, out_size), jnp.float32),
        grid=grid,
        in_specs=[
            pl.BlockSpec((tile_n, in_size), lambda i: (i, 0)),   # x: batch-tiled
            pl.BlockSpec((in_size, hdim), lambda i: (0, 0)),     # W1: resident
            pl.BlockSpec((1, hdim), lambda i: (0, 0)),           # b1: resident
            pl.BlockSpec((hdim, out_size), lambda i: (0, 0)),    # W2: resident
            pl.BlockSpec((1, out_size), lambda i: (0, 0)),       # b2: resident
        ],
        out_specs=pl.BlockSpec((tile_n, out_size), lambda i: (i, 0)),
        compiler_params=pltpu.CompilerParams(
            dimension_semantics=("parallel",),   # batch axis -> both TCs on v7x
        ),
        cost_estimate=pl.CostEstimate(
            flops=flops, transcendentals=0, bytes_accessed=bytes_accessed),
    )(x_p, w1_p, b1_p, w2_p, b2_p)

    # Strip any batch padding (feature dims were never padded).
    return out_padded[:N] if n_pad != N else out_padded


# TODO(synk): training utilities (standardize/step/SGD+momentum/loss) are not
# part of forward() and are not implemented as Pallas kernels.

if __name__ == "__main__":
    # Small shapes consistent with the module: (N, in_size) -> h=64 -> out_size
    N, in_size, hdim, out_size = 8, 32, 64, 4

    key = jax.random.PRNGKey(0)
    kx, k1, kb1, k2, kb2 = jax.random.split(key, 5)

    x = jax.random.normal(kx, (N, in_size), dtype=jnp.float32)

    # Deterministic parameter init (PyTorch-style uniform bounds 1/sqrt(fan_in)).
    bound1 = 1.0 / jnp.sqrt(in_size)
    w1_t = jax.random.uniform(k1, (in_size, hdim), jnp.float32, -bound1, bound1)
    b1 = jax.random.uniform(kb1, (1, hdim), jnp.float32, -bound1, bound1)

    bound2 = 1.0 / jnp.sqrt(hdim)
    w2_t = jax.random.uniform(k2, (hdim, out_size), jnp.float32, -bound2, bound2)
    b2 = jax.random.uniform(kb2, (1, out_size), jnp.float32, -bound2, bound2)

    y = neuralnet_forward(x, w1_t, b1, w2_t, b2)
    y = jax.block_until_ready(y)
    assert y.shape == (N, out_size)

    # Pure-JAX f32 reference (kernel is now full f32, so tolerance is tight).
    ref = jnp.maximum(x @ w1_t + b1, 0.0) @ w2_t + b2
    assert jnp.allclose(y, ref, atol=1e-5, rtol=1e-5), (
        f"max abs err = {jnp.max(jnp.abs(y - ref))}")

    print("KERNEL_OK")
</pallas_src>

<mosaic_0001>
module attributes {stable_mosaic.version = 11 : i64} {
  func.func @mlp_kernel(%arg0: i32, %arg1: memref<8x32xf32, #tpu.memory_space<vmem>>, %arg2: memref<32x64xf32, #tpu.memory_space<vmem>>, %arg3: memref<1x64xf32, #tpu.memory_space<vmem>>, %arg4: memref<64x4xf32, #tpu.memory_space<vmem>>, %arg5: memref<1x4xf32, #tpu.memory_space<vmem>>, %arg6: memref<8x4xf32, #tpu.memory_space<vmem>>) attributes {dimension_semantics = [#tpu.dimension_semantics<parallel>], iteration_bounds = array<i64: 1>, scalar_prefetch = 0 : i64, scratch_operands = 0 : i64, tpu.core_type = #tpu.core_type<tc>, window_params = [{transform_indices = @transform_0, window_bounds = array<i64: 8, 32>}, {pipeline_mode = #tpu.pipeline_mode<synchronous>, transform_indices = @transform_1, window_bounds = array<i64: 32, 64>}, {pipeline_mode = #tpu.pipeline_mode<synchronous>, transform_indices = @transform_2, window_bounds = array<i64: 1, 64>}, {pipeline_mode = #tpu.pipeline_mode<synchronous>, transform_indices = @transform_3, window_bounds = array<i64: 64, 4>}, {pipeline_mode = #tpu.pipeline_mode<synchronous>, transform_indices = @transform_4, window_bounds = array<i64: 1, 4>}, {transform_indices = @transform_5, window_bounds = array<i64: 8, 4>}]} {
    %c0 = arith.constant 0 : index
    %c0_0 = arith.constant 0 : index
    %0 = vector.load %arg1[%c0, %c0_0] : memref<8x32xf32, #tpu.memory_space<vmem>>, vector<8x32xf32>
    %c0_1 = arith.constant 0 : index
    %c0_2 = arith.constant 0 : index
    %1 = vector.load %arg2[%c0_1, %c0_2] : memref<32x64xf32, #tpu.memory_space<vmem>>, vector<32x64xf32>
    %cst = arith.constant dense<0.000000e+00> : vector<8x64xf32>
    %2 = tpu.matmul %0, %1, %cst {dimension_numbers = #tpu.dot_dimension_numbers<[1], [0], [0], [1], [0, 0, 1, 1], [], []>} : vector<8x32xf32>, vector<32x64xf32>, vector<8x64xf32> -> vector<8x64xf32>
    %c0_3 = arith.constant 0 : index
    %c0_4 = arith.constant 0 : index
    %3 = vector.load %arg3[%c0_3, %c0_4] : memref<1x64xf32, #tpu.memory_space<vmem>>, vector<1x64xf32>
    %4 = vector.broadcast %3 : vector<1x64xf32> to vector<8x64xf32>
    %5 = arith.addf %2, %4 : vector<8x64xf32>
    %cst_5 = arith.constant 0.000000e+00 : f32
    %6 = vector.broadcast %cst_5 : f32 to vector<8x64xf32>
    %7 = arith.maximumf %5, %6 : vector<8x64xf32>
    %c0_6 = arith.constant 0 : index
    %c0_7 = arith.constant 0 : index
    %8 = vector.load %arg4[%c0_6, %c0_7] : memref<64x4xf32, #tpu.memory_space<vmem>>, vector<64x4xf32>
    %cst_8 = arith.constant dense<0.000000e+00> : vector<8x4xf32>
    %9 = tpu.matmul %7, %8, %cst_8 {dimension_numbers = #tpu.dot_dimension_numbers<[1], [0], [0], [1], [0, 0, 1, 1], [], []>} : vector<8x64xf32>, vector<64x4xf32>, vector<8x4xf32> -> vector<8x4xf32>
    %c0_9 = arith.constant 0 : index
    %c0_10 = arith.constant 0 : index
    %10 = vector.load %arg5[%c0_9, %c0_10] : memref<1x4xf32, #tpu.memory_space<vmem>>, vector<1x4xf32>
    %11 = vector.broadcast %10 : vector<1x4xf32> to vector<8x4xf32>
    %12 = arith.addf %9, %11 : vector<8x4xf32>
    %c0_11 = arith.constant 0 : index
    %c0_12 = arith.constant 0 : index
    %13 = vector.load %arg6[%c0_11, %c0_12] : memref<8x4xf32, #tpu.memory_space<vmem>>, vector<8x4xf32>
    tpu.vector_store %arg6[%c0_11, %c0_12], %12 {strides = array<i32>} : memref<8x4xf32, #tpu.memory_space<vmem>>, vector<8x4xf32>,
    return
  }
  func.func @transform_0(%arg0: i32) -> (i32, i32) {
    %c0_i32 = arith.constant 0 : i32
    %c0_i32_0 = arith.constant 0 : i32
    return %arg0, %c0_i32 : i32, i32
  }
  func.func @transform_1(%arg0: i32) -> (i32, i32) {
    %c0_i32 = arith.constant 0 : i32
    %c0_i32_0 = arith.constant 0 : i32
    %c0_i32_1 = arith.constant 0 : i32
    return %c0_i32, %c0_i32_0 : i32, i32
  }
  func.func @transform_2(%arg0: i32) -> (i32, i32) {
    %c0_i32 = arith.constant 0 : i32
    %c0_i32_0 = arith.constant 0 : i32
    %c0_i32_1 = arith.constant 0 : i32
    return %c0_i32, %c0_i32_0 : i32, i32
  }
  func.func @transform_3(%arg0: i32) -> (i32, i32) {
    %c0_i32 = arith.constant 0 : i32
    %c0_i32_0 = arith.constant 0 : i32
    %c0_i32_1 = arith.constant 0 : i32
    return %c0_i32, %c0_i32_0 : i32, i32
  }
  func.func @transform_4(%arg0: i32) -> (i32, i32) {
    %c0_i32 = arith.constant 0 : i32
    %c0_i32_0 = arith.constant 0 : i32
    %c0_i32_1 = arith.constant 0 : i32
    return %c0_i32, %c0_i32_0 : i32, i32
  }
  func.func @transform_5(%arg0: i32) -> (i32, i32) {
    %c0_i32 = arith.constant 0 : i32
    %c0_i32_0 = arith.constant 0 : i32
    return %arg0, %c0_i32 : i32, i32
  }
}

</mosaic_0001>

<bundles_post_ra>
// kernel: tpu_custom_call.1
= control target key start
LH: loop header
LB: loop body
LE: loop exit
PB: predicated region body
PF: predicated region fallthrough
CT: control target
= control target key end

     0   :  { %v271_v0 = vmov 0.0|0.0   ;;  %vm272_vm0 = vmmov 0   ;;  %v273_v4 = vmov 0.0   ;;  %vm32_vm1 = vcmask 261120   ;;  %s352_s1 = inlined_call_operand.vmem [shape: f32[32,64], index: 1, kind: input, shape index: {}]   ;;  %s353_s3 = inlined_call_operand.vmem [shape: f32[64,4], index: 3, kind: input, shape index: {}]   ;;  %s354_s0 = inlined_call_operand.vmem [shape: f32[8,32], index: 0, kind: input, shape index: {}]   ;;  %s355_s2 = inlined_call_operand.vmem [shape: f32[1,64], index: 2, kind: input, shape index: {}]   ;;  %s356_s4 = inlined_call_operand.vmem [shape: f32[1,4], index: 4, kind: input, shape index: {}]   ;;  %s357_s5 = inlined_call_operand.vmem [shape: f32[8,4], index: 5, kind: output, shape index: {}]  }
   0x1   :  { %250 = vmatprep.subr.bf16.mxu0 %v271_v0  ;;  %v21_v1 = vld [vmem:[%s352_s1] sm:$0xff]  ;;  %v22_v2 = vld [vmem:[%s352_s1 + $0x8] sm:$0xff]  ;;  %v23_v3 = vld [vmem:[%s352_s1 + $0x10] sm:$0xff]  ;;  %228 = vmatprep.mubr.msk.f32.mxu0 %vm272_vm0, %v273_v4  ;;  %vm122_vm2 = vcmask 523264   ;;  %vm196_vm3 = vcmask 31744  }
   0x2   :  { %v251_v5 = vpack.c.bf16 %v22_v2, %v21_v1  ;;  %v24_v6 = vld [vmem:[%s352_s1 + $0x18] sm:$0xff]  ;;  %256 = vmatprep.subr.bf16.mxu1 %v271_v0  ;;  %v107_v7 = vld [vmem:[%s353_s3] sm:$0xff]  ;;  %247 = vmatprep.mubr.msk.f32.mxu1 %vm272_vm0, %v273_v4  ;;  %v108_v8 = vld [vmem:[%s353_s3 + $0x8] sm:$0xff] }
   0x3   :  { %v109_v9 = vld [vmem:[%s353_s3 + $0x10] sm:$0xff]  ;;  %v110_v10 = vld [vmem:[%s353_s3 + $0x18] sm:$0xff]  ;;  %v254_v11 = vpack.c.bf16 %v24_v6, %v23_v3  ;;  %v257_v12 = vpack.c.bf16 %v108_v8, %v107_v7  ;;  %v111_v14 = vld [vmem:[%s353_s3 + $0x20] sm:$0xff] }
   0x4   :  { %252 = vmatpush3.bf16.msra.mxu0 %v251_v5  ;;  %v260_v13 = vpack.c.bf16 %v110_v10, %v109_v9  ;;  %v112_v15 = vld [vmem:[%s353_s3 + $0x28] sm:$0xff]  ;;  %v20_v16 = vld [vmem:[%s354_s0] sm:$0xff]  ;;  %v113_v18 = vld [vmem:[%s353_s3 + $0x30] sm:$0xff] }
   0x5   :  { %253 = vmatprep.subr.bf16.mxu0 %v271_v0  ;;  %258 = vmatpush3.bf16.msra.mxu1 %v257_v12  ;;  %v263_v17 = vpack.c.bf16 %v112_v15, %v111_v14  ;;  %v114_v19 = vld [vmem:[%s353_s3 + $0x38] sm:$0xff]  ;;  %v202_v21 = vld [vmem:[%s355_s2] ss:$0 sm:$0xff] }
   0x6   :  { %259 = vmatprep.subr.bf16.mxu1 %v271_v0  ;;  %v266_v20 = vpack.c.bf16 %v114_v19, %v113_v18  ;;  %v204_v26 = vld [vmem:[%s356_s4] ss:$0 sm:$0xff] }
   0x8   :  { %255 = vmatpush3.bf16.msra.mxu0 %v254_v11 }
   0x9   :  { %261 = vmatpush3.bf16.msra.mxu1 %v260_v13 }
   0xa   :  { %262 = vmatprep.subr.bf16.mxu1 %v271_v0 }
   0xb   :  { %229 = vmatmul.mubr.msk.f32.vlgmr.msra.gmra.mrb[0].mxu0 %vm32_vm1, %v20_v16 }
   0xd   :  { %264 = vmatpush3.bf16.msra.mxu1 %v263_v17 }
   0xe   :  { %265 = vmatprep.subr.bf16.mxu1 %v271_v0 }
  0x11   :  { %267 = vmatpush3.bf16.msra.mxu1 %v266_v20 }
  0xde   :  { %v102_v22 = vpop.f32.mrb[0].mxu0 }
  0xdf   :  { %v103_v23 = vadd.f32 %v202_v21, %v102_v22  ;;  %v230_v24 = vpop.f32.mrb[1].mxu0 }
  0xe1   :  { %v106_v25 = vmax.f32 %v103_v23, 0.0 }
  0xe3   :  { %248 = vmatmul.mubr.msk.f32.vlgmr.msra.gmra.mrb[0].mxu1 %vm122_vm2, %v106_v25 }
 0x1b6   :  { %v192_v27 = vpop.f32.mrb[0].mxu1 }
 0x1b7   :  { %v193_v28 = vadd.f32 %v204_v26, %v192_v27  ;;  %v249_v29 = vpop.f32.mrb[1].mxu1 }
 0x1b9   :  { %197 = vst.msk [vmem:[%s357_s5] sm:$0xff] %vm196_vm3, %v193_v28 }

</bundles_post_ra>
